<compile_context>
chip_gen: v7x
topology: tpu7x:2x2x1
jax: 0.10.0
libtpu: 0.0.40
codegen_flags: <defaults>
</compile_context>

<pallas_src>
import math
from functools import partial

import jax
import jax.numpy as jnp
import numpy as np
from jax import lax
from jax.experimental import pallas as pl
from jax.experimental.pallas import tpu as pltpu


def _routed_xattn_kernel(x_ref, wqkv_ref, bqkv_ref, wo_ref, bo_ref, out_ref, *,
                         num_heads, head_size, num_routes, seq_len):
    f32 = jnp.float32
    bf16 = jnp.bfloat16
    H = num_heads * head_size
    KS = num_routes * seq_len              # flattened (candidate, position) axis
    scale = 1.0 / math.sqrt(float(head_size))

    x = x_ref[0].astype(bf16)                                          # (KS, H)

    # ---- fused Q|K|V projection: one (KS,H)x(H,3H) bf16 MXU matmul, f32 accumulation.
    qkv = jnp.dot(x, wqkv_ref[...], preferred_element_type=f32) + bqkv_ref[...]
    q = qkv[:, 0:H]
    k = qkv[:, H:2 * H]
    v = qkv[:, 2 * H:3 * H]

    # ---- head-expanded K/V (row block h keeps only head h's feature columns).
    # Masks come from iota compares (no HBM mask operands); concat is along sublanes.
    col = lax.broadcasted_iota(jnp.int32, (KS, H), 1)
    k_parts, v_parts = [], []
    for h in range(num_heads):
        in_h = (col >= h * head_size) & (col < (h + 1) * head_size)
        k_parts.append(jnp.where(in_h, k, 0.0))
        v_parts.append(jnp.where(in_h, v, 0.0))
    k_exp = jnp.concatenate(k_parts, axis=0).astype(bf16)              # (heads*KS, H)
    v_exp = jnp.concatenate(v_parts, axis=0).astype(bf16)              # (heads*KS, H)

    # ---- scores[i, h*KS + j] = <q_i, k_j> restricted to head h, scaled.
    scores = lax.dot_general(q.astype(bf16), k_exp,
                             (((1,), (1,)), ((), ())),
                             preferred_element_type=f32) * scale       # (KS, heads*KS)

    # ---- candidate mask, additive and BEFORE the row max (robust softmax).
    # One-hot candidate ids (division-free); valid[i,c] via a tiny 0/1 matmul.
    qi = lax.broadcasted_iota(jnp.int32, (KS, num_routes), 0)
    ci = lax.broadcasted_iota(jnp.int32, (KS, num_routes), 1)
    cand_onehot = ((qi >= ci * seq_len) & (qi < (ci + 1) * seq_len)).astype(f32)
    cc = jnp.concatenate([cand_onehot] * num_heads, axis=0)            # (heads*KS, K)
    valid = lax.dot_general(cand_onehot.astype(bf16), cc.astype(bf16),
                            (((1,), (1,)), ((), ())),
                            preferred_element_type=f32)                # (KS, heads*KS)
    scores = jnp.where(valid > 0.5, scores, -1e30)

    m = jnp.max(scores, axis=-1, keepdims=True)      # row max over valid entries only
    e = jnp.exp(scores - m)                          # masked entries underflow to 0.0

    # ---- factored per-(query, head) softmax denominator:
    # e @ head_ind -> (KS, heads), 1/x on one vreg (EUP), broadcast back with a tiny matmul.
    hl = lax.broadcasted_iota(jnp.int32, (KS, num_heads), 1)
    head_ind = jnp.concatenate([(hl == h).astype(f32) for h in range(num_heads)],
                               axis=0).astype(bf16)                    # (heads*KS, heads)
    denom = jnp.dot(e.astype(bf16), head_ind, preferred_element_type=f32)   # (KS, heads)
    inv = pl.reciprocal(denom, approx=True)
    inv_full = lax.dot_general(inv.astype(bf16), head_ind,
                               (((1,), (1,)), ((), ())),
                               preferred_element_type=f32)             # (KS, heads*KS)
    probs = e * inv_full

    # ---- context for all heads at once + output projection.
    ctx = jnp.dot(probs.astype(bf16), v_exp, preferred_element_type=f32)     # (KS, H)
    out_all = jnp.dot(ctx.astype(bf16), wo_ref[...],
                      preferred_element_type=f32) + bo_ref[...]              # (KS, H)

    # ---- fusion weights: mean of attention probs over (heads, queries) per key position.
    # Head blocks folded with one matmul against a sublane-tiled identity (no unaligned
    # lane slices).
    colsum = jnp.sum(probs, axis=0, keepdims=True)                     # (1, heads*KS)
    eye = (lax.broadcasted_iota(jnp.int32, (KS, KS), 0) ==
           lax.broadcasted_iota(jnp.int32, (KS, KS), 1)).astype(f32)
    fold = jnp.concatenate([eye] * num_heads, axis=0).astype(bf16)     # (heads*KS, KS)
    fw = jnp.dot(colsum.astype(bf16), fold, preferred_element_type=f32)
    fw = fw * (1.0 / float(num_heads * seq_len))                       # (1, KS)

    # ---- fused[s,:] = sum_k fw[k*S+s] * out_all[k*S+s,:] via one selection matmul
    # (no lane->sublane transpose of fw).
    si = lax.broadcasted_iota(jnp.int32, (seq_len, KS), 0)
    sj = lax.broadcasted_iota(jnp.int32, (seq_len, KS), 1)
    sel = (sj == si)
    for kk in range(1, num_routes):
        sel = sel | (sj == si + kk * seq_len)
    weighted = (sel.astype(f32) * fw).astype(bf16)                     # (S, KS)
    out_ref[0] = jnp.dot(weighted, out_all.astype(bf16), preferred_element_type=f32)


@partial(jax.jit, static_argnums=(2,))
def routed_cross_attention(hidden_states, params, num_heads):
    """hidden_states: (K, S, H) or (B, K, S, H). Returns (S, H) or (B, S, H)."""
    squeeze = hidden_states.ndim == 3
    hs = hidden_states[None] if squeeze else hidden_states
    B, K, S, H = hs.shape
    head_size = H // num_heads
    assert head_size * num_heads == H
    KS = K * S

    # Fused QKV parameters (weights in bf16 for the MXU; biases stay f32 — they are added
    # to the f32-accumulated matmul result).
    wqkv = jnp.concatenate([params["wq"], params["wk"], params["wv"]], axis=1).astype(jnp.bfloat16)
    bqkv = jnp.concatenate([params["bq"], params["bk"], params["bv"]], axis=1)
    wo = params["wo"].astype(jnp.bfloat16)
    bo = params["bo"]

    x = hs.reshape(B, KS, H)

    kernel = partial(_routed_xattn_kernel, num_heads=num_heads,
                     head_size=head_size, num_routes=K, seq_len=S)

    out = pl.pallas_call(
        kernel,
        out_shape=jax.ShapeDtypeStruct((B, S, H), jnp.float32),
        grid=(B,),
        in_specs=[
            pl.BlockSpec((1, KS, H), lambda b: (b, 0, 0)),      # per-instance activations
            pl.BlockSpec((H, 3 * H), lambda b: (0, 0)),         # fused QKV weight (resident)
            pl.BlockSpec((1, 3 * H), lambda b: (0, 0)),
            pl.BlockSpec((H, H), lambda b: (0, 0)),             # output weight (resident)
            pl.BlockSpec((1, H), lambda b: (0, 0)),
        ],
        out_specs=pl.BlockSpec((1, S, H), lambda b: (b, 0, 0)),
        compiler_params=pltpu.CompilerParams(
            dimension_semantics=("parallel",)),                 # batch split across TCs (v7x)
    )(x, wqkv, bqkv, wo, bo)
    return out[0] if squeeze else out


def _reference(hs, p, num_heads):
    """Pure-JAX reference mirroring the PyTorch forward (eval mode)."""
    K, S, H = hs.shape
    dh = H // num_heads

    def proj(w, b):
        return hs @ w + b[0]

    def split(x):
        return x.reshape(K, S, num_heads, dh).transpose(0, 2, 1, 3)

    q = split(proj(p["wq"], p["bq"]))
    k = split(proj(p["wk"], p["bk"]))
    v = split(proj(p["wv"], p["bv"]))
    scores = jnp.einsum("khqd,khsd->khqs", q, k) / math.sqrt(dh)
    probs = jax.nn.softmax(scores, axis=-1)
    ctx = jnp.einsum("khqs,khsd->khqd", probs, v).transpose(0, 2, 1, 3).reshape(K, S, H)
    out = ctx @ p["wo"] + p["bo"][0]
    fw = probs.mean(axis=(1, 2))           # (K, S)
    return jnp.sum(out * fw[..., None], axis=0)


def _init_params(key, hidden_size):
    keys = jax.random.split(key, 8)
    s = 0.05
    return {
        "wq": s * jax.random.normal(keys[0], (hidden_size, hidden_size), jnp.float32),
        "bq": s * jax.random.normal(keys[1], (1, hidden_size), jnp.float32),
        "wk": s * jax.random.normal(keys[2], (hidden_size, hidden_size), jnp.float32),
        "bk": s * jax.random.normal(keys[3], (1, hidden_size), jnp.float32),
        "wv": s * jax.random.normal(keys[4], (hidden_size, hidden_size), jnp.float32),
        "bv": s * jax.random.normal(keys[5], (1, hidden_size), jnp.float32),
        "wo": s * jax.random.normal(keys[6], (hidden_size, hidden_size), jnp.float32),
        "bo": s * jax.random.normal(keys[7], (1, hidden_size), jnp.float32),
    }


if __name__ == "__main__":
    K, S, H = 3, 8, 32          # candidates, min_ra_len, hidden_size
    num_heads = 8               # head_size = 4

    root = jax.random.PRNGKey(0)
    k_x, k_p = jax.random.split(root)
    hidden_states = jax.random.normal(k_x, (K, S, H), jnp.float32)
    params = _init_params(k_p, H)

    # Single-instance path (matches the PyTorch module's forward signature).
    fused = routed_cross_attention(hidden_states, params, num_heads)
    fused = jax.block_until_ready(fused)
    ref = _reference(hidden_states, params, num_heads)
    # Tolerance accounts for bf16 MXU operands + EUP approximate reciprocal.
    np.testing.assert_allclose(np.asarray(fused), np.asarray(ref), rtol=2e-2, atol=2e-3)

    # Batched path: grid=(B,), "parallel" semantics (exercises the megacore split on v7x).
    hs_b = jax.random.normal(jax.random.PRNGKey(1), (2, K, S, H), jnp.float32)
    fused_b = jax.block_until_ready(routed_cross_attention(hs_b, params, num_heads))
    ref_b = jnp.stack([_reference(hs_b[i], params, num_heads) for i in range(2)])
    np.testing.assert_allclose(np.asarray(fused_b), np.asarray(ref_b), rtol=2e-2, atol=2e-3)

    print("KERNEL_OK")
</pallas_src>

<mosaic_0001>
module attributes {stable_mosaic.version = 11 : i64} {
  func.func @_routed_xattn_kernel(%arg0: i32, %arg1: memref<1x24x32xf32, #tpu.memory_space<vmem>>, %arg2: memref<32x96xbf16, #tpu.memory_space<vmem>>, %arg3: memref<1x96xf32, #tpu.memory_space<vmem>>, %arg4: memref<32x32xbf16, #tpu.memory_space<vmem>>, %arg5: memref<1x32xf32, #tpu.memory_space<vmem>>, %arg6: memref<1x8x32xf32, #tpu.memory_space<vmem>>) attributes {dimension_semantics = [#tpu.dimension_semantics<parallel>], iteration_bounds = array<i64: 1>, scalar_prefetch = 0 : i64, scratch_operands = 0 : i64, tpu.core_type = #tpu.core_type<tc>, window_params = [{transform_indices = @transform_0, window_bounds = array<i64: 1, 24, 32>}, {pipeline_mode = #tpu.pipeline_mode<synchronous>, transform_indices = @transform_1, window_bounds = array<i64: 32, 96>}, {pipeline_mode = #tpu.pipeline_mode<synchronous>, transform_indices = @transform_2, window_bounds = array<i64: 1, 96>}, {pipeline_mode = #tpu.pipeline_mode<synchronous>, transform_indices = @transform_3, window_bounds = array<i64: 32, 32>}, {pipeline_mode = #tpu.pipeline_mode<synchronous>, transform_indices = @transform_4, window_bounds = array<i64: 1, 32>}, {transform_indices = @transform_5, window_bounds = array<i64: 1, 8, 32>}]} {
    %c0 = arith.constant 0 : index
    %c0_0 = arith.constant 0 : index
    %c0_1 = arith.constant 0 : index
    %0 = vector.load %arg1[%c0, %c0_0, %c0_1] : memref<1x24x32xf32, #tpu.memory_space<vmem>>, vector<1x24x32xf32>
    %1 = vector.shape_cast %0 : vector<1x24x32xf32> to vector<24x32xf32>
    %2 = arith.truncf %1 : vector<24x32xf32> to vector<24x32xbf16>
    %c0_2 = arith.constant 0 : index
    %c0_3 = arith.constant 0 : index
    %3 = vector.load %arg2[%c0_2, %c0_3] : memref<32x96xbf16, #tpu.memory_space<vmem>>, vector<32x96xbf16>
    %cst = arith.constant dense<0.000000e+00> : vector<24x96xf32>
    %4 = tpu.matmul %2, %3, %cst {dimension_numbers = #tpu.dot_dimension_numbers<[1], [0], [0], [1], [0, 0, 1, 1], [], []>} : vector<24x32xbf16>, vector<32x96xbf16>, vector<24x96xf32> -> vector<24x96xf32>
    %c0_4 = arith.constant 0 : index
    %c0_5 = arith.constant 0 : index
    %5 = vector.load %arg3[%c0_4, %c0_5] : memref<1x96xf32, #tpu.memory_space<vmem>>, vector<1x96xf32>
    %6 = vector.broadcast %5 : vector<1x96xf32> to vector<24x96xf32>
    %7 = arith.addf %4, %6 : vector<24x96xf32>
    %8 = vector.extract_strided_slice %7 {offsets = [0, 0], sizes = [24, 32], strides = [1, 1]} : vector<24x96xf32> to vector<24x32xf32>
    %9 = vector.extract_strided_slice %7 {offsets = [0, 32], sizes = [24, 32], strides = [1, 1]} : vector<24x96xf32> to vector<24x32xf32>
    %10 = vector.extract_strided_slice %7 {offsets = [0, 64], sizes = [24, 32], strides = [1, 1]} : vector<24x96xf32> to vector<24x32xf32>
    %11 = tpu.iota {dimensions = array<i32: 1>} : vector<24x32xi32>
    %c0_i32 = arith.constant 0 : i32
    %12 = vector.broadcast %c0_i32 : i32 to vector<24x32xi32>
    %13 = arith.cmpi sge, %11, %12 : vector<24x32xi32>
    %c4_i32 = arith.constant 4 : i32
    %14 = vector.broadcast %c4_i32 : i32 to vector<24x32xi32>
    %15 = arith.cmpi slt, %11, %14 : vector<24x32xi32>
    %16 = arith.andi %13, %15 : vector<24x32xi1>
    %cst_6 = arith.constant 0.000000e+00 : f32
    %17 = vector.broadcast %cst_6 : f32 to vector<24x32xf32>
    %18 = arith.select %16, %9, %17 : vector<24x32xi1>, vector<24x32xf32>
    %cst_7 = arith.constant 0.000000e+00 : f32
    %19 = vector.broadcast %cst_7 : f32 to vector<24x32xf32>
    %20 = arith.select %16, %10, %19 : vector<24x32xi1>, vector<24x32xf32>
    %c4_i32_8 = arith.constant 4 : i32
    %21 = vector.broadcast %c4_i32_8 : i32 to vector<24x32xi32>
    %22 = arith.cmpi sge, %11, %21 : vector<24x32xi32>
    %c8_i32 = arith.constant 8 : i32
    %23 = vector.broadcast %c8_i32 : i32 to vector<24x32xi32>
    %24 = arith.cmpi slt, %11, %23 : vector<24x32xi32>
    %25 = arith.andi %22, %24 : vector<24x32xi1>
    %cst_9 = arith.constant 0.000000e+00 : f32
    %26 = vector.broadcast %cst_9 : f32 to vector<24x32xf32>
    %27 = arith.select %25, %9, %26 : vector<24x32xi1>, vector<24x32xf32>
    %cst_10 = arith.constant 0.000000e+00 : f32
    %28 = vector.broadcast %cst_10 : f32 to vector<24x32xf32>
    %29 = arith.select %25, %10, %28 : vector<24x32xi1>, vector<24x32xf32>
    %c8_i32_11 = arith.constant 8 : i32
    %30 = vector.broadcast %c8_i32_11 : i32 to vector<24x32xi32>
    %31 = arith.cmpi sge, %11, %30 : vector<24x32xi32>
    %c12_i32 = arith.constant 12 : i32
    %32 = vector.broadcast %c12_i32 : i32 to vector<24x32xi32>
    %33 = arith.cmpi slt, %11, %32 : vector<24x32xi32>
    %34 = arith.andi %31, %33 : vector<24x32xi1>
    %cst_12 = arith.constant 0.000000e+00 : f32
    %35 = vector.broadcast %cst_12 : f32 to vector<24x32xf32>
    %36 = arith.select %34, %9, %35 : vector<24x32xi1>, vector<24x32xf32>
    %cst_13 = arith.constant 0.000000e+00 : f32
    %37 = vector.broadcast %cst_13 : f32 to vector<24x32xf32>
    %38 = arith.select %34, %10, %37 : vector<24x32xi1>, vector<24x32xf32>
    %c12_i32_14 = arith.constant 12 : i32
    %39 = vector.broadcast %c12_i32_14 : i32 to vector<24x32xi32>
    %40 = arith.cmpi sge, %11, %39 : vector<24x32xi32>
    %c16_i32 = arith.constant 16 : i32
    %41 = vector.broadcast %c16_i32 : i32 to vector<24x32xi32>
    %42 = arith.cmpi slt, %11, %41 : vector<24x32xi32>
    %43 = arith.andi %40, %42 : vector<24x32xi1>
    %cst_15 = arith.constant 0.000000e+00 : f32
    %44 = vector.broadcast %cst_15 : f32 to vector<24x32xf32>
    %45 = arith.select %43, %9, %44 : vector<24x32xi1>, vector<24x32xf32>
    %cst_16 = arith.constant 0.000000e+00 : f32
    %46 = vector.broadcast %cst_16 : f32 to vector<24x32xf32>
    %47 = arith.select %43, %10, %46 : vector<24x32xi1>, vector<24x32xf32>
    %c16_i32_17 = arith.constant 16 : i32
    %48 = vector.broadcast %c16_i32_17 : i32 to vector<24x32xi32>
    %49 = arith.cmpi sge, %11, %48 : vector<24x32xi32>
    %c20_i32 = arith.constant 20 : i32
    %50 = vector.broadcast %c20_i32 : i32 to vector<24x32xi32>
    %51 = arith.cmpi slt, %11, %50 : vector<24x32xi32>
    %52 = arith.andi %49, %51 : vector<24x32xi1>
    %cst_18 = arith.constant 0.000000e+00 : f32
    %53 = vector.broadcast %cst_18 : f32 to vector<24x32xf32>
    %54 = arith.select %52, %9, %53 : vector<24x32xi1>, vector<24x32xf32>
    %cst_19 = arith.constant 0.000000e+00 : f32
    %55 = vector.broadcast %cst_19 : f32 to vector<24x32xf32>
    %56 = arith.select %52, %10, %55 : vector<24x32xi1>, vector<24x32xf32>
    %c20_i32_20 = arith.constant 20 : i32
    %57 = vector.broadcast %c20_i32_20 : i32 to vector<24x32xi32>
    %58 = arith.cmpi sge, %11, %57 : vector<24x32xi32>
    %c24_i32 = arith.constant 24 : i32
    %59 = vector.broadcast %c24_i32 : i32 to vector<24x32xi32>
    %60 = arith.cmpi slt, %11, %59 : vector<24x32xi32>
    %61 = arith.andi %58, %60 : vector<24x32xi1>
    %cst_21 = arith.constant 0.000000e+00 : f32
    %62 = vector.broadcast %cst_21 : f32 to vector<24x32xf32>
    %63 = arith.select %61, %9, %62 : vector<24x32xi1>, vector<24x32xf32>
    %cst_22 = arith.constant 0.000000e+00 : f32
    %64 = vector.broadcast %cst_22 : f32 to vector<24x32xf32>
    %65 = arith.select %61, %10, %64 : vector<24x32xi1>, vector<24x32xf32>
    %c24_i32_23 = arith.constant 24 : i32
    %66 = vector.broadcast %c24_i32_23 : i32 to vector<24x32xi32>
    %67 = arith.cmpi sge, %11, %66 : vector<24x32xi32>
    %c28_i32 = arith.constant 28 : i32
    %68 = vector.broadcast %c28_i32 : i32 to vector<24x32xi32>
    %69 = arith.cmpi slt, %11, %68 : vector<24x32xi32>
    %70 = arith.andi %67, %69 : vector<24x32xi1>
    %cst_24 = arith.constant 0.000000e+00 : f32
    %71 = vector.broadcast %cst_24 : f32 to vector<24x32xf32>
    %72 = arith.select %70, %9, %71 : vector<24x32xi1>, vector<24x32xf32>
    %cst_25 = arith.constant 0.000000e+00 : f32
    %73 = vector.broadcast %cst_25 : f32 to vector<24x32xf32>
    %74 = arith.select %70, %10, %73 : vector<24x32xi1>, vector<24x32xf32>
    %c28_i32_26 = arith.constant 28 : i32
    %75 = vector.broadcast %c28_i32_26 : i32 to vector<24x32xi32>
    %76 = arith.cmpi sge, %11, %75 : vector<24x32xi32>
    %c32_i32 = arith.constant 32 : i32
    %77 = vector.broadcast %c32_i32 : i32 to vector<24x32xi32>
    %78 = arith.cmpi slt, %11, %77 : vector<24x32xi32>
    %79 = arith.andi %76, %78 : vector<24x32xi1>
    %cst_27 = arith.constant 0.000000e+00 : f32
    %80 = vector.broadcast %cst_27 : f32 to vector<24x32xf32>
    %81 = arith.select %79, %9, %80 : vector<24x32xi1>, vector<24x32xf32>
    %cst_28 = arith.constant 0.000000e+00 : f32
    %82 = vector.broadcast %cst_28 : f32 to vector<24x32xf32>
    %83 = arith.select %79, %10, %82 : vector<24x32xi1>, vector<24x32xf32>
    %84 = tpu.concatenate %18, %27, %36, %45, %54, %63, %72, %81 in 0 : vector<24x32xf32>, vector<24x32xf32>, vector<24x32xf32>, vector<24x32xf32>, vector<24x32xf32>, vector<24x32xf32>, vector<24x32xf32>, vector<24x32xf32> -> vector<192x32xf32>
    %85 = arith.truncf %84 : vector<192x32xf32> to vector<192x32xbf16>
    %86 = tpu.concatenate %20, %29, %38, %47, %56, %65, %74, %83 in 0 : vector<24x32xf32>, vector<24x32xf32>, vector<24x32xf32>, vector<24x32xf32>, vector<24x32xf32>, vector<24x32xf32>, vector<24x32xf32>, vector<24x32xf32> -> vector<192x32xf32>
    %87 = arith.truncf %86 : vector<192x32xf32> to vector<192x32xbf16>
    %88 = arith.truncf %8 : vector<24x32xf32> to vector<24x32xbf16>
    %cst_29 = arith.constant dense<0.000000e+00> : vector<24x192xf32>
    %89 = tpu.matmul %88, %85, %cst_29 {dimension_numbers = #tpu.dot_dimension_numbers<[1], [1], [0], [0], [0, 0, 1, 0], [], []>} : vector<24x32xbf16>, vector<192x32xbf16>, vector<24x192xf32> -> vector<24x192xf32>
    %cst_30 = arith.constant 5.000000e-01 : f32
    %90 = vector.broadcast %cst_30 : f32 to vector<24x192xf32>
    %91 = arith.mulf %89, %90 : vector<24x192xf32>
    %92 = tpu.iota {dimensions = array<i32: 0>} : vector<24x3xi32>
    %93 = tpu.iota {dimensions = array<i32: 1>} : vector<24x3xi32>
    %c8_i32_31 = arith.constant 8 : i32
    %94 = vector.broadcast %c8_i32_31 : i32 to vector<24x3xi32>
    %95 = arith.muli %93, %94 : vector<24x3xi32>
    %96 = arith.cmpi sge, %92, %95 : vector<24x3xi32>
    %c1_i32 = arith.constant 1 : i32
    %97 = vector.broadcast %c1_i32 : i32 to vector<24x3xi32>
    %98 = arith.addi %93, %97 : vector<24x3xi32>
    %c8_i32_32 = arith.constant 8 : i32
    %99 = vector.broadcast %c8_i32_32 : i32 to vector<24x3xi32>
    %100 = arith.muli %98, %99 : vector<24x3xi32>
    %101 = arith.cmpi slt, %92, %100 : vector<24x3xi32>
    %102 = arith.andi %96, %101 : vector<24x3xi1>
    %103 = arith.extui %102 : vector<24x3xi1> to vector<24x3xi32>
    %104 = arith.sitofp %103 : vector<24x3xi32> to vector<24x3xf32>
    %105 = tpu.concatenate %104, %104, %104, %104, %104, %104, %104, %104 in 0 : vector<24x3xf32>, vector<24x3xf32>, vector<24x3xf32>, vector<24x3xf32>, vector<24x3xf32>, vector<24x3xf32>, vector<24x3xf32>, vector<24x3xf32> -> vector<192x3xf32>
    %106 = arith.truncf %104 : vector<24x3xf32> to vector<24x3xbf16>
    %107 = arith.truncf %105 : vector<192x3xf32> to vector<192x3xbf16>
    %cst_33 = arith.constant dense<0.000000e+00> : vector<24x192xf32>
    %108 = tpu.matmul %106, %107, %cst_33 {dimension_numbers = #tpu.dot_dimension_numbers<[1], [1], [0], [0], [0, 0, 1, 0], [], []>} : vector<24x3xbf16>, vector<192x3xbf16>, vector<24x192xf32> -> vector<24x192xf32>
    %cst_34 = arith.constant 5.000000e-01 : f32
    %109 = vector.broadcast %cst_34 : f32 to vector<24x192xf32>
    %110 = arith.cmpf ogt, %108, %109 : vector<24x192xf32>
    %cst_35 = arith.constant -1.000000e+30 : f32
    %111 = vector.broadcast %cst_35 : f32 to vector<24x192xf32>
    %112 = arith.select %110, %91, %111 : vector<24x192xi1>, vector<24x192xf32>
    %cst_36 = arith.constant dense<0xFF800000> : vector<24xf32>
    %113 = vector.multi_reduction <maximumf>, %112, %cst_36 [1] : vector<24x192xf32> to vector<24xf32>
    %114 = vector.shape_cast %113 : vector<24xf32> to vector<24x1xf32>
    %115 = vector.broadcast %114 : vector<24x1xf32> to vector<24x192xf32>
    %116 = arith.subf %112, %115 : vector<24x192xf32>
    %117 = math.exp %116 : vector<24x192xf32>
    %118 = tpu.iota {dimensions = array<i32: 1>} : vector<24x8xi32>
    %c0_i32_37 = arith.constant 0 : i32
    %119 = vector.broadcast %c0_i32_37 : i32 to vector<24x8xi32>
    %120 = arith.cmpi eq, %118, %119 : vector<24x8xi32>
    %121 = arith.extui %120 : vector<24x8xi1> to vector<24x8xi32>
    %122 = arith.sitofp %121 : vector<24x8xi32> to vector<24x8xf32>
    %c1_i32_38 = arith.constant 1 : i32
    %123 = vector.broadcast %c1_i32_38 : i32 to vector<24x8xi32>
    %124 = arith.cmpi eq, %118, %123 : vector<24x8xi32>
    %125 = arith.extui %124 : vector<24x8xi1> to vector<24x8xi32>
    %126 = arith.sitofp %125 : vector<24x8xi32> to vector<24x8xf32>
    %c2_i32 = arith.constant 2 : i32
    %127 = vector.broadcast %c2_i32 : i32 to vector<24x8xi32>
    %128 = arith.cmpi eq, %118, %127 : vector<24x8xi32>
    %129 = arith.extui %128 : vector<24x8xi1> to vector<24x8xi32>
    %130 = arith.sitofp %129 : vector<24x8xi32> to vector<24x8xf32>
    %c3_i32 = arith.constant 3 : i32
    %131 = vector.broadcast %c3_i32 : i32 to vector<24x8xi32>
    %132 = arith.cmpi eq, %118, %131 : vector<24x8xi32>
    %133 = arith.extui %132 : vector<24x8xi1> to vector<24x8xi32>
    %134 = arith.sitofp %133 : vector<24x8xi32> to vector<24x8xf32>
    %c4_i32_39 = arith.constant 4 : i32
    %135 = vector.broadcast %c4_i32_39 : i32 to vector<24x8xi32>
    %136 = arith.cmpi eq, %118, %135 : vector<24x8xi32>
    %137 = arith.extui %136 : vector<24x8xi1> to vector<24x8xi32>
    %138 = arith.sitofp %137 : vector<24x8xi32> to vector<24x8xf32>
    %c5_i32 = arith.constant 5 : i32
    %139 = vector.broadcast %c5_i32 : i32 to vector<24x8xi32>
    %140 = arith.cmpi eq, %118, %139 : vector<24x8xi32>
    %141 = arith.extui %140 : vector<24x8xi1> to vector<24x8xi32>
    %142 = arith.sitofp %141 : vector<24x8xi32> to vector<24x8xf32>
    %c6_i32 = arith.constant 6 : i32
    %143 = vector.broadcast %c6_i32 : i32 to vector<24x8xi32>
    %144 = arith.cmpi eq, %118, %143 : vector<24x8xi32>
    %145 = arith.extui %144 : vector<24x8xi1> to vector<24x8xi32>
    %146 = arith.sitofp %145 : vector<24x8xi32> to vector<24x8xf32>
    %c7_i32 = arith.constant 7 : i32
    %147 = vector.broadcast %c7_i32 : i32 to vector<24x8xi32>
    %148 = arith.cmpi eq, %118, %147 : vector<24x8xi32>
    %149 = arith.extui %148 : vector<24x8xi1> to vector<24x8xi32>
    %150 = arith.sitofp %149 : vector<24x8xi32> to vector<24x8xf32>
    %151 = tpu.concatenate %122, %126, %130, %134, %138, %142, %146, %150 in 0 : vector<24x8xf32>, vector<24x8xf32>, vector<24x8xf32>, vector<24x8xf32>, vector<24x8xf32>, vector<24x8xf32>, vector<24x8xf32>, vector<24x8xf32> -> vector<192x8xf32>
    %152 = arith.truncf %151 : vector<192x8xf32> to vector<192x8xbf16>
    %153 = arith.truncf %117 : vector<24x192xf32> to vector<24x192xbf16>
    %cst_40 = arith.constant dense<0.000000e+00> : vector<24x8xf32>
    %154 = tpu.matmul %153, %152, %cst_40 {dimension_numbers = #tpu.dot_dimension_numbers<[1], [0], [0], [1], [0, 0, 1, 1], [], []>} : vector<24x192xbf16>, vector<192x8xbf16>, vector<24x8xf32> -> vector<24x8xf32>
    %155 = tpu.reciprocal %154 {approx = true} : vector<24x8xf32> -> vector<24x8xf32>
    %156 = arith.truncf %155 : vector<24x8xf32> to vector<24x8xbf16>
    %cst_41 = arith.constant dense<0.000000e+00> : vector<24x192xf32>
    %157 = tpu.matmul %156, %152, %cst_41 {dimension_numbers = #tpu.dot_dimension_numbers<[1], [1], [0], [0], [0, 0, 1, 0], [], []>} : vector<24x8xbf16>, vector<192x8xbf16>, vector<24x192xf32> -> vector<24x192xf32>
    %158 = arith.mulf %117, %157 : vector<24x192xf32>
    %159 = arith.truncf %158 : vector<24x192xf32> to vector<24x192xbf16>
    %cst_42 = arith.constant dense<0.000000e+00> : vector<24x32xf32>
    %160 = tpu.matmul %159, %87, %cst_42 {dimension_numbers = #tpu.dot_dimension_numbers<[1], [0], [0], [1], [0, 0, 1, 1], [], []>} : vector<24x192xbf16>, vector<192x32xbf16>, vector<24x32xf32> -> vector<24x32xf32>
    %161 = arith.truncf %160 : vector<24x32xf32> to vector<24x32xbf16>
    %c0_43 = arith.constant 0 : index
    %c0_44 = arith.constant 0 : index
    %162 = vector.load %arg4[%c0_43, %c0_44] : memref<32x32xbf16, #tpu.memory_space<vmem>>, vector<32x32xbf16>
    %cst_45 = arith.constant dense<0.000000e+00> : vector<24x32xf32>
    %163 = tpu.matmul %161, %162, %cst_45 {dimension_numbers = #tpu.dot_dimension_numbers<[1], [0], [0], [1], [0, 0, 1, 1], [], []>} : vector<24x32xbf16>, vector<32x32xbf16>, vector<24x32xf32> -> vector<24x32xf32>
    %c0_46 = arith.constant 0 : index
    %c0_47 = arith.constant 0 : index
    %164 = vector.load %arg5[%c0_46, %c0_47] : memref<1x32xf32, #tpu.memory_space<vmem>>, vector<1x32xf32>
    %165 = vector.broadcast %164 : vector<1x32xf32> to vector<24x32xf32>
    %166 = arith.addf %163, %165 : vector<24x32xf32>
    %cst_48 = arith.constant dense<0.000000e+00> : vector<192xf32>
    %167 = vector.multi_reduction <add>, %158, %cst_48 [0] : vector<24x192xf32> to vector<192xf32>
    %168 = vector.shape_cast %167 : vector<192xf32> to vector<1x192xf32>
    %169 = tpu.iota {dimensions = array<i32: 0>} : vector<24x24xi32>
    %170 = tpu.iota {dimensions = array<i32: 1>} : vector<24x24xi32>
    %171 = arith.cmpi eq, %169, %170 : vector<24x24xi32>
    %172 = arith.extui %171 : vector<24x24xi1> to vector<24x24xi32>
    %173 = arith.sitofp %172 : vector<24x24xi32> to vector<24x24xf32>
    %174 = tpu.concatenate %173, %173, %173, %173, %173, %173, %173, %173 in 0 : vector<24x24xf32>, vector<24x24xf32>, vector<24x24xf32>, vector<24x24xf32>, vector<24x24xf32>, vector<24x24xf32>, vector<24x24xf32>, vector<24x24xf32> -> vector<192x24xf32>
    %175 = arith.truncf %174 : vector<192x24xf32> to vector<192x24xbf16>
    %176 = arith.truncf %168 : vector<1x192xf32> to vector<1x192xbf16>
    %cst_49 = arith.constant dense<0.000000e+00> : vector<1x24xf32>
    %177 = tpu.matmul %176, %175, %cst_49 {dimension_numbers = #tpu.dot_dimension_numbers<[1], [0], [0], [1], [0, 0, 1, 1], [], []>} : vector<1x192xbf16>, vector<192x24xbf16>, vector<1x24xf32> -> vector<1x24xf32>
    %cst_50 = arith.constant 1.562500e-02 : f32
    %178 = vector.broadcast %cst_50 : f32 to vector<1x24xf32>
    %179 = arith.mulf %177, %178 : vector<1x24xf32>
    %180 = tpu.iota {dimensions = array<i32: 0>} : vector<8x24xi32>
    %181 = tpu.iota {dimensions = array<i32: 1>} : vector<8x24xi32>
    %182 = arith.cmpi eq, %181, %180 : vector<8x24xi32>
    %c8_i32_51 = arith.constant 8 : i32
    %183 = vector.broadcast %c8_i32_51 : i32 to vector<8x24xi32>
    %184 = arith.addi %180, %183 : vector<8x24xi32>
    %185 = arith.cmpi eq, %181, %184 : vector<8x24xi32>
    %186 = arith.ori %182, %185 : vector<8x24xi1>
    %c16_i32_52 = arith.constant 16 : i32
    %187 = vector.broadcast %c16_i32_52 : i32 to vector<8x24xi32>
    %188 = arith.addi %180, %187 : vector<8x24xi32>
    %189 = arith.cmpi eq, %181, %188 : vector<8x24xi32>
    %190 = arith.ori %186, %189 : vector<8x24xi1>
    %191 = arith.extui %190 : vector<8x24xi1> to vector<8x24xi32>
    %192 = arith.sitofp %191 : vector<8x24xi32> to vector<8x24xf32>
    %193 = vector.broadcast %179 : vector<1x24xf32> to vector<8x24xf32>
    %194 = arith.mulf %192, %193 : vector<8x24xf32>
    %195 = arith.truncf %194 : vector<8x24xf32> to vector<8x24xbf16>
    %196 = arith.truncf %166 : vector<24x32xf32> to vector<24x32xbf16>
    %cst_53 = arith.constant dense<0.000000e+00> : vector<8x32xf32>
    %197 = tpu.matmul %195, %196, %cst_53 {dimension_numbers = #tpu.dot_dimension_numbers<[1], [0], [0], [1], [0, 0, 1, 1], [], []>} : vector<8x24xbf16>, vector<24x32xbf16>, vector<8x32xf32> -> vector<8x32xf32>
    %c0_54 = arith.constant 0 : index
    %c0_55 = arith.constant 0 : index
    %c0_56 = arith.constant 0 : index
    %198 = vector.load %arg6[%c0_54, %c0_55, %c0_56] : memref<1x8x32xf32, #tpu.memory_space<vmem>>, vector<1x8x32xf32>
    %199 = vector.shape_cast %198 : vector<1x8x32xf32> to vector<8x32xf32>
    %200 = vector.shape_cast %197 : vector<8x32xf32> to vector<1x8x32xf32>
    tpu.vector_store %arg6[%c0_54, %c0_55, %c0_56], %200 {strides = array<i32>} : memref<1x8x32xf32, #tpu.memory_space<vmem>>, vector<1x8x32xf32>,
    return
  }
  func.func @transform_0(%arg0: i32) -> (i32, i32, i32) {
    %c0_i32 = arith.constant 0 : i32
    %c0_i32_0 = arith.constant 0 : i32
    %c0_i32_1 = arith.constant 0 : i32
    return %arg0, %c0_i32, %c0_i32_0 : i32, i32, i32
  }
  func.func @transform_1(%arg0: i32) -> (i32, i32) {
    %c0_i32 = arith.constant 0 : i32
    %c0_i32_0 = arith.constant 0 : i32
    %c0_i32_1 = arith.constant 0 : i32
    return %c0_i32, %c0_i32_0 : i32, i32
  }
  func.func @transform_2(%arg0: i32) -> (i32, i32) {
    %c0_i32 = arith.constant 0 : i32
    %c0_i32_0 = arith.constant 0 : i32
    %c0_i32_1 = arith.constant 0 : i32
    return %c0_i32, %c0_i32_0 : i32, i32
  }
  func.func @transform_3(%arg0: i32) -> (i32, i32) {
    %c0_i32 = arith.constant 0 : i32
    %c0_i32_0 = arith.constant 0 : i32
    %c0_i32_1 = arith.constant 0 : i32
    return %c0_i32, %c0_i32_0 : i32, i32
  }
  func.func @transform_4(%arg0: i32) -> (i32, i32) {
    %c0_i32 = arith.constant 0 : i32
    %c0_i32_0 = arith.constant 0 : i32
    %c0_i32_1 = arith.constant 0 : i32
    return %c0_i32, %c0_i32_0 : i32, i32
  }
  func.func @transform_5(%arg0: i32) -> (i32, i32, i32) {
    %c0_i32 = arith.constant 0 : i32
    %c0_i32_0 = arith.constant 0 : i32
    %c0_i32_1 = arith.constant 0 : i32
    return %arg0, %c0_i32, %c0_i32_0 : i32, i32, i32
  }
}

</mosaic_0001>

<bundles_post_ra>
// kernel: routed_cross_attention.1
= control target key start
LH: loop header
LB: loop body
LE: loop exit
PB: predicated region body
PF: predicated region fallthrough
CT: control target
= control target key end

     0   :  { %vm1790_vm0 = vcmask 261120   ;;  %s1784_s0 = inlined_call_operand.vmem [shape: f32[1,24,32], index: 0, kind: input, shape index: {}]   ;;  %s1785_s1 = inlined_call_operand.vmem [shape: bf16[32,96], index: 1, kind: input, shape index: {}]   ;;  %s1786_s2 = inlined_call_operand.vmem [shape: f32[1,96], index: 2, kind: input, shape index: {}]   ;;  %s1787_s3 = inlined_call_operand.vmem [shape: bf16[32,32], index: 3, kind: input, shape index: {}]   ;;  %s1788_s4 = inlined_call_operand.vmem [shape: f32[1,32], index: 4, kind: input, shape index: {}]   ;;  %s1789_s5 = inlined_call_operand.hbm [shape: f32[1,8,32], index: 5, kind: output, shape index: {}]  }
   0x1   :  { %v1122_v0 = vld [vmem:[%s1785_s1] sm:$0xff]   ;;  %v1123_v1 = vld [vmem:[%s1785_s1 + $0x8] sm:$0xff]   ;;  %v24_v4 = vld [vmem:[%s1784_s0 + $0x10] sm:$0xff] }
   0x2   :  { %1081 = vmatprep.subr.bf16.mxu1 %v1122_v0  ;;  %v22_v2 = vld [vmem:[%s1784_s0] sm:$0xff]  ;;  %v23_v3 = vld [vmem:[%s1784_s0 + $0x8] sm:$0xff] }
   0x3   :  { %1082 = vmatpush3.bf16.msra.mxu1 %v1122_v0  ;;  %v25_v5 = vpack.c.bf16 %v23_v3, %v22_v2 }
   0x4   :  { %1083 = vmatprep.subr.bf16.mxu1 %v1123_v1 }
   0x5   :  { %10 = vsyncpa [#allocation3], 0  ;;  %1085 = vmatprep.mubr.msk.bf16.mxu1 %vm1790_vm0, %v25_v5  ;;  %v26_v6 = vpack.c.bf16 %v24_v4, %v24_v4  ;;  %v105_v7 = vlaneseq  ;;  %v1168_v14 = vmov 0.0   ;;  %v1169_v16 = vmov 0   ;;  %v949_v22 = vld [vmem:[%s1786_s2] ss:$0 sm:$0xff] }
   0x6   :  { %364 = vmatprep.subr.bf16.mxu0 %v1169_v16  ;;  %vm351_vm7 = vcmask 23552   ;;  %396 = vmatprep.mubr.bf16.mxu0 %v1169_v16  ;;  %s1170_s2 = smov 96   ;;  %s1172_s28 = smov 64  }
   0x7   :  { %1084 = vmatpush3.bf16.msra.mxu1 %v1123_v1  ;;  %v1222_v8 = vand.u32 127, %v105_v7  ;;  %v1224_v9 = vshrl.u32 %v105_v7, 7 }
   0x8   :  { %268 = vmatprep.subr.bf16.mxu1 %v1169_v16 }
   0x9   :  { %v333_v10 = vadd.s32 1, %v1222_v8  ;;  %v1228_v11 = vadd.s32 8, %v1224_v9  ;;  %v329_v12 = vmul.u32 8, %v1222_v8  ;;  %v1243_v20 = vadd.s32 16, %v1224_v9 }
   0xa   :  { %1086 = vmatmul.mubr.msk.bf16.vlgmr.msra.gmra.mrb[0].mxu1 %vm1790_vm0, %v26_v6  ;;  %vm1791_vm11 = vcmp.lt.s32.totalorder %v1222_v8, 4  ;;  %vm137_vm12 = vcmp.ge.s32.totalorder %v1222_v8, 4  ;;  %vm138_vm13 = vcmp.lt.s32.totalorder %v1222_v8, 8  ;;  %vm182_vm14 = vcmp.ge.s32.totalorder %v1222_v8, 24 }
   0xb   :  { %v334_v13 = vmul.u32 8, %v333_v10  ;;  %vm330_vm1 = vcmp.ge.s32.totalorder %v1224_v9, %v329_v12  ;;  %vm331_vm2 = vcmp.ge.s32.totalorder %v1228_v11, %v329_v12  ;;  %300 = vmatprep.mubr.bf16.mxu1 %v1169_v16  ;;  %vm332_vm8 = vcmp.ge.s32.totalorder %v1243_v20, %v329_v12 }
   0xc   :  { %vm183_vm15 = vcmp.lt.s32.totalorder %v1222_v8, 28 }
   0xd   :  { %vm335_vm3 = vcmp.lt.s32.totalorder %v1224_v9, %v334_v13  ;;  %vm336_vm4 = vcmp.lt.s32.totalorder %v1228_v11, %v334_v13  ;;  %vm337_vm9 = vcmp.lt.s32.totalorder %v1243_v20, %v334_v13 }
   0xe   :  { %vm338_vm5 = vmand %vm330_vm1, %vm335_vm3  ;;  %vm146_vm3 = vcmp.ge.s32.totalorder %v1222_v8, 8 }
   0xf   :  { %vm339_vm6 = vmand %vm331_vm2, %vm336_vm4  ;;  %v956_v15 = vsel %vm338_vm5, 1.0, %v1168_v14  ;;  %vm147_vm4 = vcmp.lt.s32.totalorder %v1222_v8, 12 }
  0x10   :  { %v957_v17 = vsel %vm339_vm6, 1.0, %v1168_v14  ;;  %vm340_vm10 = vmand %vm332_vm8, %vm337_vm9  ;;  %vm155_vm6 = vcmp.ge.s32.totalorder %v1222_v8, 12  ;;  %vm164_vm9 = vcmp.ge.s32.totalorder %v1222_v8, 16 }
  0x11   :  { %v347_v18 = vpack.c.bf16 %v957_v17, %v956_v15  ;;  %v958_v26 = vsel %vm340_vm10, 1.0, %v1168_v14  ;;  %vm1301_vm1 = vmand %vm137_vm12, %vm138_vm13  ;;  %vm165_vm10 = vcmp.lt.s32.totalorder %v1222_v8, 20  ;;  %vm173_vm13 = vcmp.ge.s32.totalorder %v1222_v8, 20 }
  0x12   :  { %v349_v29 = vpack.c.bf16 %v956_v15, %v958_v26  ;;  %v350_v33 = vpack.c.bf16 %v958_v26, %v957_v17  ;;  %v348_v36 = vpack.c.bf16 %v958_v26, %v958_v26  ;;  %vm1309_vm2 = vmand %vm182_vm14, %vm183_vm15  ;;  %vm174_vm14 = vcmp.lt.s32.totalorder %v1222_v8, 24 }
  0x13   :  { %v353_v19 = vsel %vm351_vm7, %v347_v18, 0  ;;  %vm1332_vm5 = vmand %vm146_vm3, %vm147_vm4  ;;  %vm191_vm3 = vcmp.ge.s32.totalorder %v1222_v8, 28  ;;  %vm192_vm4 = vcmp.lt.s32.totalorder %v1222_v8, 32 }
  0x14   :  { %365 = vmatpush1.bf16.xpose.msra.mxu0 %v353_v19  ;;  %v359_v32 = vsel %vm351_vm7, %v349_v29, 0  ;;  %v362_v35 = vsel %vm351_vm7, %v350_v33, 0  ;;  %vm1368_vm12 = vmand %vm164_vm9, %vm165_vm10  ;;  %vm461_vm9 = vcmp.eq.s32.totalorder %v1222_v8, 1 }
  0x15   :  { %366 = vmatprep.subr.bf16.mxu0 %v1169_v16  ;;  %vm1383_vm15 = vmand %vm173_vm13, %vm174_vm14 }
  0x16   :  { %vm973_vm14 = vmpackc.low %vm461_vm9, %vm461_vm9 }
  0x1c   :  { %367 = vmatpush1.bf16.xpose.msra.mxu0 %v359_v32 }
  0x1d   :  { %368 = vmatprep.subr.bf16.mxu0 %v1169_v16 }
  0x24   :  { %369 = vmatpush1.bf16.xpose.msra.mxu0 %v362_v35 }
  0x25   :  { %370 = vmatprep.subr.bf16.mxu0 %v1169_v16 }
  0x2c   :  { %371 = vmatpush1.bf16.xpose.msra.mxu0 %v353_v19 }
  0x2d   :  { %372 = vmatprep.subr.bf16.mxu0 %v1169_v16 }
  0x34   :  { %373 = vmatpush1.bf16.xpose.msra.mxu0 %v359_v32 }
  0x35   :  { %374 = vmatprep.subr.bf16.mxu0 %v1169_v16 }
  0x3c   :  { %375 = vmatpush1.bf16.xpose.msra.mxu0 %v362_v35 }
  0x3d   :  { %376 = vmatprep.subr.bf16.mxu0 %v1169_v16 }
  0x44   :  { %377 = vmatpush1.bf16.xpose.msra.mxu0 %v353_v19 }
  0x45   :  { %378 = vmatprep.subr.bf16.mxu0 %v1169_v16 }
  0x4c   :  { %379 = vmatpush1.bf16.xpose.msra.mxu0 %v359_v32 }
  0x4d   :  { %380 = vmatprep.subr.bf16.mxu0 %v1169_v16 }
  0x54   :  { %381 = vmatpush1.bf16.xpose.msra.mxu0 %v362_v35 }
  0x55   :  { %382 = vmatprep.subr.bf16.mxu0 %v1169_v16 }
  0x5c   :  { %383 = vmatpush1.bf16.xpose.msra.mxu0 %v353_v19 }
  0x5d   :  { %384 = vmatprep.subr.bf16.mxu0 %v1169_v16 }
  0x64   :  { %385 = vmatpush1.bf16.xpose.msra.mxu0 %v359_v32 }
  0x65   :  { %386 = vmatprep.subr.bf16.mxu0 %v1169_v16 }
  0x6c   :  { %387 = vmatpush1.bf16.xpose.msra.mxu0 %v362_v35 }
  0x6d   :  { %600 = vmatprep.subr.bf16.mxu0 %v1169_v16 }
  0x73   :  { %959 = vmatmul.mubr.msk.bf16.vlgmr.msra.gmra.mrb[0].mxu0 %vm351_vm7, %v347_v18 }
  0x74   :  { %406 = vmatprep.mubr.bf16.mxu0 %v1169_v16 }
  0x7b   :  { %960 = vmatmul.mubr.msk.bf16.gmra.mrb[4].mxu0 %vm351_vm7, %v348_v36  ;;  %vm156_vm7 = vcmp.lt.s32.totalorder %v1222_v8, 16 }
  0x7c   :  { %632 = vmatprep.mubr.bf16.mxu0 %v1169_v16  ;;  %vm1347_vm8 = vmand %vm155_vm6, %vm156_vm7  ;;  %vm458_vm7 = vcmp.eq.s32.totalorder %v1222_v8, 0 }
  0x7d   :  { %vm1407_vm6 = vmand %vm191_vm3, %vm192_vm4  ;;  %vm1793_vm3 = vcmp.eq.s32.totalorder %v1222_v8, 2 }
  0x7e   :  { %vm969_vm10 = vmpackc.low %vm458_vm7, %vm458_vm7 }
  0x7f   :  { %vm971_vm13 = vmpackc.low %vm461_vm9, %vm458_vm7 }
  0x80   :  { %vm975_vm4 = vmpackc.low %vm1793_vm3, %vm1793_vm3 }
  0xdd   :  { %v1087_v21 = vpop.f32.mrb[0].mxu1 }
  0xde   :  { %v91_v23 = vpop.f32.mrb[1].mxu1  ;;  %v1265_v34 = vadd.f32 %v1087_v21, %v949_v22 }
  0xdf   :  { %v1088_v24 = vpop.f32.mrb[2].mxu1  ;;  %v1252_v27 = vadd.f32 %v949_v22, %v91_v23 }
  0xe0   :  { %v94_v25 = vpop.f32.mrb[3].mxu1 }
  0xe1   :  { %v1254_v28 = vadd.f32 %v949_v22, %v94_v25 }
  0xe3   :  { %v224_v30 = vpack.c.bf16 %v1254_v28, %v1252_v27  ;;  %v1260_v31 = vpack.i.bf16 %v1254_v28, %v1252_v27  ;;  %v1171_v27 = vmov 1.0|1.0  }
  0xe5   :  { %1113 = vrot.lane.b32.xlu0 %v1260_v31, %s1170_s2 }
  0xe9   :  { %117 = vrot.lane.b32.xlu0 %v1265_v34, %s1170_s2 }
 0x157   :  { %v1114_v37 = vpop.permute.xlu0 %1113 }
 0x158   :  { %v1284_v38 = vunpack.i.h.bf16 %v1114_v37  ;;  %v1286_v39 = vunpack.i.l.bf16 %v1114_v37 }
 0x15a   :  { %v122_v40 = vsel %vm1791_vm11, %v1286_v39, 0.0  ;;  %v123_v41 = vsel %vm1791_vm11, %v1284_v38, 0.0  ;;  %v140_v48 = vsel %vm1301_vm1, %v1286_v39, 0.0  ;;  %v185_v50 = vsel %vm1309_vm2, %v1286_v39, 0.0 }
 0x15b   :  { %v1296_v42 = vpop.permute.xlu0 %117  ;;  %v200_v43 = vpack.c.bf16 %v123_v41, %v122_v40  ;;  %v186_v51 = vsel %vm1309_vm2, %v1284_v38, 0.0  ;;  %v141_v55 = vsel %vm1301_vm1, %v1284_v38, 0.0  ;;  %v149_v59 = vsel %vm1332_vm5, %v1286_v39, 0.0 }
 0x15c   :  { %v124_v46 = vsel %vm1791_vm11, %v1296_v42, 0.0  ;;  %v209_v52 = vpack.c.bf16 %v186_v51, %v185_v50  ;;  %v142_v54 = vsel %vm1301_vm1, %v1296_v42, 0.0  ;;  %v150_v60 = vsel %vm1332_vm5, %v1284_v38, 0.0 }
 0x15d   :  { %v233_v44 = vsel %vm1790_vm0, %v200_v43, 0  ;;  %v201_v49 = vpack.c.bf16 %v140_v48, %v124_v46  ;;  %v202_v56 = vpack.c.bf16 %v142_v54, %v141_v55  ;;  %v203_v61 = vpack.c.bf16 %v150_v60, %v149_v59 }
 0x15e   :  { %269 = vmatpush1.bf16.xpose.msra.mxu1 %v233_v44  ;;  %v151_v0 = vsel %vm1332_vm5, %v1296_v42, 0.0  ;;  %v158_v1 = vsel %vm1347_vm8, %v1286_v39, 0.0  ;;  %v160_v4 = vsel %vm1347_vm8, %v1296_v42, 0.0  ;;  %v159_v5 = vsel %vm1347_vm8, %v1284_v38, 0.0 }
 0x15f   :  { %270 = vmatprep.subr.bf16.mxu1 %v1169_v16  ;;  %v236_v53 = vsel %vm1790_vm0, %v201_v49, 0  ;;  %v239_v58 = vsel %vm1790_vm0, %v202_v56, 0  ;;  %v242_v62 = vsel %vm1790_vm0, %v203_v61, 0  ;;  %v204_v2 = vpack.c.bf16 %v158_v1, %v151_v0 }
 0x160   :  { %v205_v6 = vpack.c.bf16 %v160_v4, %v159_v5  ;;  %v167_v12 = vsel %vm1368_vm12, %v1286_v39, 0.0  ;;  %v168_v13 = vsel %vm1368_vm12, %v1284_v38, 0.0  ;;  %v169_v19 = vsel %vm1368_vm12, %v1296_v42, 0.0 }
 0x161   :  { %v245_v3 = vsel %vm1790_vm0, %v204_v2, 0  ;;  %v206_v15 = vpack.c.bf16 %v168_v13, %v167_v12  ;;  %v176_v21 = vsel %vm1383_vm15, %v1286_v39, 0.0  ;;  %v178_v24 = vsel %vm1383_vm15, %v1296_v42, 0.0 }
 0x162   :  { %v248_v10 = vsel %vm1790_vm0, %v205_v6, 0  ;;  %v207_v22 = vpack.c.bf16 %v176_v21, %v169_v19  ;;  %v177_v25 = vsel %vm1383_vm15, %v1284_v38, 0.0  ;;  %v260_v32 = vsel %vm1790_vm0, %v209_v52, 0 }
 0x163   :  { %v251_v17 = vsel %vm1790_vm0, %v206_v15, 0  ;;  %v208_v26 = vpack.c.bf16 %v178_v24, %v177_v25  ;;  %v187_v35 = vsel %vm1309_vm2, %v1296_v42, 0.0  ;;  %v194_v36 = vsel %vm1407_vm6, %v1286_v39, 0.0 }
 0x164   :  { %v254_v23 = vsel %vm1790_vm0, %v207_v22, 0  ;;  %v210_v37 = vpack.c.bf16 %v194_v36, %v187_v35  ;;  %v196_v41 = vsel %vm1407_vm6, %v1296_v42, 0.0  ;;  %v195_v43 = vsel %vm1407_vm6, %v1284_v38, 0.0  ;;  %v398_v42 = vpop.f32.mrb[0].mxu0 }
 0x165   :  { %v257_v29 = vsel %vm1790_vm0, %v208_v26, 0  ;;  %v211_v44 = vpack.c.bf16 %v196_v41, %v195_v43  ;;  %v225_v39 = vpack.c.bf16 %v1265_v34, %v1265_v34  ;;  %v400_v38 = vpop.f32.mrb[1].mxu0  ;;  %v962_v24 = vsel %vm461_vm9, 1.0, %v1168_v14 }
 0x166   :  { %271 = vmatpush1.bf16.xpose.msra.mxu1 %v236_v53  ;;  %v263_v40 = vsel %vm1790_vm0, %v210_v37, 0  ;;  %v402_v48 = vpop.f32.mrb[2].mxu0  ;;  %vm416_vm11 = vcmp.gt.f32.partialorder %v400_v38, 0.5  ;;  %vm1810_vm9 = vcmp.eq.s32.totalorder %v1222_v8, 3 }
 0x167   :  { %272 = vmatprep.subr.bf16.mxu1 %v1169_v16  ;;  %v266_v46 = vsel %vm1790_vm0, %v211_v44, 0  ;;  %v404_v49 = vpop.f32.mrb[3].mxu0  ;;  %v964_v41 = vsel %vm1810_vm9, 1.0, %v1168_v14  ;;  %vm1003_vm9 = vmpackc.low %vm1301_vm1, %vm1301_vm1 }
 0x168   :  { %v408_v50 = vpop.f32.mrb[4].mxu0 }
 0x169   :  { %v410_v51 = vpop.f32.mrb[5].mxu0 }
 0x16a   :  { %v412_v52 = vpop.f32.mrb[6].mxu0 }
 0x16b   :  { %v413_v53 = vpop.f32.mrb[7].mxu0 }
 0x16e   :  { %273 = vmatpush1.bf16.xpose.msra.mxu1 %v239_v58 }
 0x16f   :  { %274 = vmatprep.subr.bf16.mxu1 %v1169_v16 }
 0x176   :  { %275 = vmatpush1.bf16.xpose.msra.mxu1 %v242_v62 }
 0x177   :  { %276 = vmatprep.subr.bf16.mxu1 %v1169_v16 }
 0x17e   :  { %277 = vmatpush1.bf16.xpose.msra.mxu1 %v245_v3 }
 0x17f   :  { %278 = vmatprep.subr.bf16.mxu1 %v1169_v16 }
 0x186   :  { %279 = vmatpush1.bf16.xpose.msra.mxu1 %v248_v10 }
 0x187   :  { %280 = vmatprep.subr.bf16.mxu1 %v1169_v16 }
 0x18e   :  { %281 = vmatpush1.bf16.xpose.msra.mxu1 %v251_v17 }
 0x18f   :  { %282 = vmatprep.subr.bf16.mxu1 %v1169_v16 }
 0x196   :  { %283 = vmatpush1.bf16.xpose.msra.mxu1 %v254_v23 }
 0x197   :  { %284 = vmatprep.subr.bf16.mxu1 %v1169_v16 }
 0x19e   :  { %285 = vmatpush1.bf16.xpose.msra.mxu1 %v257_v29 }
 0x19f   :  { %286 = vmatprep.subr.bf16.mxu1 %v1169_v16 }
 0x1a6   :  { %287 = vmatpush1.bf16.xpose.msra.mxu1 %v260_v32  ;;  %v484_v32 = vpack.c.bf16 %v962_v24, %v962_v24 }
 0x1a7   :  { %288 = vmatprep.subr.bf16.mxu1 %v1169_v16 }
 0x1ae   :  { %289 = vmatpush1.bf16.xpose.msra.mxu1 %v263_v40 }
 0x1af   :  { %290 = vmatprep.subr.bf16.mxu1 %v1169_v16 }
 0x1b6   :  { %291 = vmatpush1.bf16.xpose.msra.mxu1 %v266_v46  ;;  %v487_v46 = vpack.c.bf16 %v964_v41, %v964_v41 }
 0x1b7   :  { %504 = vmatprep.subr.bf16.mxu1 %v1169_v16 }
 0x1bd   :  { %954 = vmatmul.mubr.msk.bf16.vlgmr.msra.gmra.mrb[4].mxu1 %vm1790_vm0, %v224_v30 }
 0x1be   :  { %310 = vmatprep.mubr.bf16.mxu1 %v1169_v16  ;;  %970 = vmatpush1.bf16.msk.msra.mxu1 %vm969_vm10, %v1171_v27  ;;  %vm1792_vm10 = vcmp.eq.s32.totalorder %v1222_v8, 3 }
 0x1bf   :  { %506 = vmatprep.subr.bf16.mxu1 %v1169_v16 }
 0x1c2   :  { %972 = vmatpush1.bf16.msk.msra.mxu1 %vm971_vm13, %v1171_v27  ;;  %vm977_vm13 = vmpackc.low %vm1792_vm10, %vm1793_vm3  ;;  %vm418_vm3 = vcmp.gt.f32.partialorder %v404_v49, 0.5 }
 0x1c3   :  { %508 = vmatprep.subr.bf16.mxu1 %v1169_v16 }
 0x1c5   :  { %955 = vmatmul.mubr.msk.bf16.gmra.mrb[8].mxu1 %vm1790_vm0, %v225_v39  ;;  %vm470_vm0 = vcmp.eq.s32.totalorder %v1222_v8, 4 }
 0x1c6   :  { %974 = vmatpush1.bf16.msk.msra.mxu1 %vm973_vm14, %v1171_v27  ;;  %vm979_vm14 = vmpackc.low %vm1792_vm10, %vm1792_vm10  ;;  %vm1794_vm10 = vcmask 523264  }
 0x1c7   :  { %510 = vmatprep.subr.bf16.mxu1 %v1169_v16 }
 0x1ca   :  { %976 = vmatpush1.bf16.msk.msra.mxu1 %vm975_vm4, %v1171_v27  ;;  %vm981_vm4 = vmpackc.low %vm470_vm0, %vm470_vm0 }
 0x1cb   :  { %512 = vmatprep.subr.bf16.mxu1 %v1169_v16 }
 0x1ce   :  { %978 = vmatpush1.bf16.msk.msra.mxu1 %vm977_vm13, %v1171_v27  ;;  %vm415_vm13 = vcmp.gt.f32.partialorder %v398_v42, 0.5  ;;  %v965_v42 = vsel %vm470_vm0, 1.0, %v1168_v14 }
 0x1cf   :  { %514 = vmatprep.subr.bf16.mxu1 %v1169_v16  ;;  %v488_v38 = vpack.c.bf16 %v965_v42, %v965_v42 }
 0x1d2   :  { %980 = vmatpush1.bf16.msk.msra.mxu1 %vm979_vm14, %v1171_v27  ;;  %vm417_vm14 = vcmp.gt.f32.partialorder %v402_v48, 0.5 }
 0x1d3   :  { %516 = vmatprep.subr.bf16.mxu1 %v1169_v16 }
 0x1d6   :  { %982 = vmatpush1.bf16.msk.msra.mxu1 %vm981_vm4, %v1171_v27  ;;  %vm419_vm4 = vcmp.gt.f32.partialorder %v408_v50, 0.5 }
 0x1d7   :  { %518 = vmatprep.subr.bf16.mxu1 %v1169_v16 }
 0x290   :  { %v302_v28 = vpop.f32.mrb[4].mxu1 }
 0x291   :  { %v319_v30 = vmul.f32 0.5, %v302_v28  ;;  %v304_v54 = vpop.f32.mrb[5].mxu1 }
 0x292   :  { %v320_v55 = vmul.f32 0.5, %v304_v54  ;;  %v306_v56 = vpop.f32.mrb[6].mxu1 }
 0x293   :  { %v321_v58 = vmul.f32 0.5, %v306_v56  ;;  %v308_v59 = vpop.f32.mrb[7].mxu1  ;;  %v1478_v60 = vsel %vm415_vm13, %v319_v30, -1e+30 }
 0x294   :  { %v322_v61 = vmul.f32 0.5, %v308_v59  ;;  %v1480_v62 = vsel %vm416_vm11, %v320_v55, -1e+30  ;;  %vm420_vm11 = vcmp.gt.f32.partialorder %v410_v51, 0.5 }
 0x295   :  { %v428_v0 = vsel %vm1794_vm10, %v1480_v62, -inf  ;;  %v1484_v1 = vsel %vm417_vm14, %v321_v58, -1e+30 }
 0x296   :  { %v1486_v2 = vsel %vm418_vm3, %v322_v61, -1e+30  ;;  %v429_v3 = vmax.f32 %v1478_v60, %v428_v0  ;;  %vm473_vm3 = vcmp.eq.s32.totalorder %v1222_v8, 5 }
 0x297   :  { %v432_v4 = vsel %vm1794_vm10, %v1486_v2, -inf  ;;  %vm983_vm13 = vmpackc.low %vm473_vm3, %vm470_vm0  ;;  %v966_v49 = vsel %vm473_vm3, 1.0, %v1168_v14  ;;  %vm1811_vm0 = vcmp.lt.s32.totalorder %v1222_v8, 4 }
 0x298   :  { %430 = vmax.xlane.f32.xlu1 %v429_v3  ;;  %v312_v5 = vpop.f32.mrb[8].mxu1  ;;  %v433_v15 = vmax.f32 %v1484_v1, %v432_v4  ;;  %984 = vmatpush1.bf16.msk.msra.mxu1 %vm983_vm13, %v1171_v27  ;;  %vm985_vm14 = vmpackc.low %vm473_vm3, %vm473_vm3  ;;  %v489_v50 = vpack.c.bf16 %v966_v49, %v965_v42  ;;  %v490_v30 = vpack.c.bf16 %v966_v49, %v966_v49  ;;  %vm1812_vm3 = vcmask 523264  }
 0x299   :  { %v323_v6 = vmul.f32 0.5, %v312_v5  ;;  %v314_v10 = vpop.f32.mrb[9].mxu1  ;;  %520 = vmatprep.subr.bf16.mxu1 %v1169_v16 }
 0x29a   :  { %v324_v12 = vmul.f32 0.5, %v314_v10  ;;  %v316_v13 = vpop.f32.mrb[10].mxu1 }
 0x29b   :  { %v1492_v17 = vsel %vm419_vm4, %v323_v6, -1e+30  ;;  %v317_v19 = vpop.f32.mrb[11].mxu1  ;;  %vm476_vm4 = vcmp.eq.s32.totalorder %v1222_v8, 6 }
 0x29c   :  { %v1494_v21 = vsel %vm420_vm11, %v324_v12, -1e+30  ;;  %434 = vmax.xlane.f32.xlu1 %v433_v15  ;;  %986 = vmatpush1.bf16.msk.msra.mxu1 %vm985_vm14, %v1171_v27  ;;  %vm479_vm11 = vcmp.eq.s32.totalorder %v1222_v8, 7  ;;  %vm987_vm13 = vmpackc.low %vm476_vm4, %vm476_vm4 }
 0x29d   :  { %v436_v22 = vsel %vm1794_vm10, %v1494_v21, -inf  ;;  %522 = vmatprep.subr.bf16.mxu1 %v1169_v16  ;;  %vm989_vm10 = vmpackc.low %vm479_vm11, %vm476_vm4  ;;  %v968_v45 = vsel %vm479_vm11, 1.0, %v1168_v14 }
 0x29e   :  { %v437_v23 = vmax.f32 %v1492_v17, %v436_v22  ;;  %vm991_vm14 = vmpackc.low %vm479_vm11, %vm479_vm11  ;;  %v493_v47 = vpack.c.bf16 %v968_v45, %v968_v45 }
 0x2a0   :  { %438 = vmax.xlane.f32.xlu0 %v437_v23  ;;  %988 = vmatpush1.bf16.msk.msra.mxu1 %vm987_vm13, %v1171_v27  ;;  %vm557_vm13 = vcmask 64512  }
 0x2a1   :  { %524 = vmatprep.subr.bf16.mxu1 %v1169_v16  ;;  %v571_v35 = vsel %vm557_vm13, %v484_v32, 0  ;;  %v580_v39 = vsel %vm557_vm13, %v487_v46, 0  ;;  %v583_v48 = vsel %vm557_vm13, %v488_v38, 0  ;;  %v586_v51 = vsel %vm557_vm13, %v489_v50, 0 }
 0x2a2   :  { %v589_v61 = vsel %vm557_vm13, %v490_v30, 0  ;;  %v598_v7 = vsel %vm557_vm13, %v493_v47, 0 }
 0x2a4   :  { %990 = vmatpush1.bf16.msk.msra.mxu1 %vm989_vm10, %v1171_v27  ;;  %vm997_vm10 = vmpackc.low %vm1811_vm0, %vm1811_vm0 }
 0x2a5   :  { %526 = vmatprep.subr.bf16.mxu1 %v1169_v16 }
 0x2a8   :  { %992 = vmatpush1.bf16.msk.msra.mxu1 %vm991_vm14, %v1171_v27 }
 0x2a9   :  { %667 = vmatprep.subr.bf16.mxu1 %v1169_v16 }
 0x2ad   :  { %1118 = vrot.lane.b32.xlu1 %v1260_v31, %s1172_s28  ;;  %v961_v31 = vsel %vm458_vm7, 1.0, %v1168_v14  ;;  %vm1809_vm7 = vcmp.eq.s32.totalorder %v1222_v8, 2 }
 0x2ae   :  { %v483_v26 = vpack.c.bf16 %v962_v24, %v961_v31  ;;  %v963_v36 = vsel %vm1809_vm7, 1.0, %v1168_v14  ;;  %vm1814_vm7 = vmmov %vm1812_vm3 }
 0x2af   :  { %v485_v37 = vpack.c.bf16 %v963_v36, %v963_v36  ;;  %v486_v43 = vpack.c.bf16 %v964_v41, %v963_v36 }
 0x2b0   :  { %v568_v29 = vsel %vm557_vm13, %v483_v26, 0 }
 0x2b1   :  { %129 = vrot.lane.b32.xlu1 %v1265_v34, %s1172_s28  ;;  %v482_v34 = vpack.c.bf16 %v961_v31, %v961_v31  ;;  %v574_v40 = vsel %vm557_vm13, %v485_v37, 0  ;;  %v577_v44 = vsel %vm557_vm13, %v486_v43, 0 }
 0x2b3   :  { %v565_v25 = vsel %vm557_vm13, %v482_v34, 0 }
 0x2b4   :  { %601 = vmatpush1.bf16.xpose.msra.mxu0 %v565_v25 }
 0x2b5   :  { %602 = vmatprep.subr.bf16.mxu0 %v1169_v16 }
 0x2bc   :  { %603 = vmatpush1.bf16.xpose.msra.mxu0 %v568_v29 }
 0x2bd   :  { %604 = vmatprep.subr.bf16.mxu0 %v1169_v16 }
 0x2c4   :  { %605 = vmatpush1.bf16.xpose.msra.mxu0 %v571_v35 }
 0x2c5   :  { %606 = vmatprep.subr.bf16.mxu0 %v1169_v16 }
 0x2cc   :  { %607 = vmatpush1.bf16.xpose.msra.mxu0 %v574_v40 }
 0x2cd   :  { %608 = vmatprep.subr.bf16.mxu0 %v1169_v16 }
 0x2d4   :  { %609 = vmatpush1.bf16.xpose.msra.mxu0 %v577_v44 }
 0x2d5   :  { %610 = vmatprep.subr.bf16.mxu0 %v1169_v16 }
 0x2dc   :  { %611 = vmatpush1.bf16.xpose.msra.mxu0 %v580_v39 }
 0x2dd   :  { %612 = vmatprep.subr.bf16.mxu0 %v1169_v16 }
 0x2e4   :  { %613 = vmatpush1.bf16.xpose.msra.mxu0 %v583_v48 }
 0x2e5   :  { %614 = vmatprep.subr.bf16.mxu0 %v1169_v16 }
 0x2ec   :  { %615 = vmatpush1.bf16.xpose.msra.mxu0 %v586_v51 }
 0x2ed   :  { %616 = vmatprep.subr.bf16.mxu0 %v1169_v16 }
 0x2f4   :  { %617 = vmatpush1.bf16.xpose.msra.mxu0 %v589_v61 }
 0x2f5   :  { %618 = vmatprep.subr.bf16.mxu0 %v1169_v16 }
 0x325   :  { %v431_v52 = vpop.xlane.xlu1 %430 }
 0x326   :  { %v440_v53 = vsub.f32 %v1478_v60, %v431_v52  ;;  %v441_v28 = vsub.f32 %v1480_v62, %v431_v52  ;;  %v1573_v60 = vsel %vm476_vm4, 1.0, %v1168_v14  ;;  %vm1813_vm4 = vmmov %vm1811_vm0  ;;  %v880_v52 = vsub.s32 0, %v1224_v9 }
 0x327   :  { %vm1000_vm14 = vmpackc.low %vm1301_vm1, %vm1813_vm4  ;;  %v492_v57 = vpack.c.bf16 %v968_v45, %v1573_v60 }
 0x328   :  { %v446_v54 = vmul.f32 1.442695, %v440_v53  ;;  %v448_v55 = vmul.f32 1.442695, %v441_v28  ;;  %vm1006_vm0 = vmpackc.low %vm1332_vm5, %vm1332_vm5  ;;  %v1124_v53 = vld [vmem:[%s1787_s3] sm:$0xff]  }
 0x329   :  { %v435_v56 = vpop.xlane.xlu1 %434  ;;  %vm1012_vm1 = vmpackc.low %vm1347_vm8, %vm1347_vm8  ;;  %v595_v63 = vsel %vm557_vm13, %v492_v57, 0 }
 0x32a   :  { %v442_v58 = vsub.f32 %v1484_v1, %v435_v56  ;;  %v443_v59 = vsub.f32 %v1486_v2, %v435_v56  ;;  %1126 = vpow2.f32 %v446_v54  ;;  %v491_v2 = vpack.c.bf16 %v1573_v60, %v1573_v60  ;;  %vm1024_vm4 = vmpackc.low %vm1309_vm2, %vm1309_vm2 }
 0x32b   :  { %1128 = vpow2.f32 %v448_v55 }
 0x32c   :  { %v450_v0 = vmul.f32 1.442695, %v442_v58  ;;  %v452_v3 = vmul.f32 1.442695, %v443_v59  ;;  %v592_v10 = vsel %vm557_vm13, %v491_v2, 0 }
 0x32d   :  { %v439_v62 = vpop.xlane.xlu0 %438  ;;  %v1119_v12 = vpop.permute.xlu1 %1118  ;;  %619 = vmatpush1.bf16.xpose.msra.mxu0 %v592_v10 }
 0x32e   :  { %1130 = vpow2.f32 %v450_v0  ;;  %v444_v4 = vsub.f32 %v1492_v17, %v439_v62  ;;  %v445_v1 = vsub.f32 %v1494_v21, %v439_v62  ;;  %620 = vmatprep.subr.bf16.mxu0 %v1169_v16  ;;  %v1121_v19 = vunpack.i.h.bf16 %v1119_v12 }
 0x32f   :  { %1132 = vpow2.f32 %v452_v3  ;;  %v1120_v21 = vunpack.i.l.bf16 %v1119_v12 }
 0x330   :  { %v456_v5 = vmul.f32 1.442695, %v445_v1  ;;  %v454_v6 = vmul.f32 1.442695, %v444_v4 }
 0x331   :  { %v998_v34 = vpack.c.bf16 %v1121_v19, %v1120_v21  ;;  %v130_v25 = vpop.permute.xlu1 %129 }
 0x332   :  { %1134 = vpow2.f32 %v456_v5  ;;  %v1001_v32 = vpack.c.bf16 %v1120_v21, %v130_v25  ;;  %v1004_v36 = vpack.c.bf16 %v130_v25, %v1121_v19 }
 0x333   :  { %1136 = vpow2.f32 %v454_v6 }
 0x334   :  { %v1581_v13 = vpop.eup %1126 }
 0x335   :  { %v1583_v15 = vpop.eup %1128  ;;  %621 = vmatpush1.bf16.xpose.msra.mxu0 %v595_v63  ;;  %v1125_v63 = vld [vmem:[%s1787_s3 + $0x8] sm:$0xff]  }
 0x336   :  { %622 = vmatprep.subr.bf16.mxu0 %v1169_v16 }
 0x338   :  { %v1586_v17 = vpop.eup %1130 }
 0x339   :  { %v1588_v22 = vpop.eup %1132  ;;  %v494_v23 = vpack.c.bf16 %v1586_v17, %v1581_v13 }
 0x33a   :  { %v495_v31 = vpack.c.bf16 %v1588_v22, %v1583_v15 }
 0x33c   :  { %993 = vmatprep.mubr.msk.bf16.mxu1 %vm1812_vm3, %v495_v31  ;;  %v1598_v24 = vpop.eup %1134  ;;  %vm1015_vm3 = vmpackc.low %vm1368_vm12, %vm1368_vm12 }
 0x33d   :  { %537 = vmatmul.mubr.bf16.vlgmr.msra.gmra.mrb[12].mxu1 %v494_v23  ;;  %v497_v26 = vpack.c.bf16 %v1598_v24, %v1598_v24  ;;  %v1607_v29 = vpop.eup %1136  ;;  %623 = vmatpush1.bf16.xpose.msra.mxu0 %v598_v7 }
 0x33e   :  { %999 = vmatpush1.bf16.msk.msra.mxu1 %vm997_vm10, %v998_v34  ;;  %v496_v35 = vpack.c.bf16 %v1607_v29, %v1607_v29  ;;  %vm1009_vm10 = vmpackc.low %vm1347_vm8, %vm1332_vm5  ;;  %830 = vmatprep.subr.bf16.mxu0 %v1169_v16 }
 0x33f   :  { %669 = vmatprep.subr.bf16.mxu1 %v1169_v16  ;;  %994 = vmatprep.mubr.msk.bf16.mxu1 %vm1814_vm7, %v497_v26  ;;  %vm1018_vm5 = vmpackc.low %vm1383_vm15, %vm1368_vm12 }
 0x340   :  { %vm1021_vm8 = vmpackc.low %vm1383_vm15, %vm1383_vm15 }
 0x341   :  { %vm1027_vm12 = vmpackc.low %vm1407_vm6, %vm1309_vm2  ;;  %vm813_vm2 = vcmp.eq.s32.totalorder %v1224_v9, %v1222_v8 }
 0x342   :  { %1002 = vmatpush1.bf16.msk.msra.mxu1 %vm1000_vm14, %v1001_v32  ;;  %vm1030_vm15 = vmpackc.low %vm1407_vm6, %vm1407_vm6  ;;  %vm814_vm6 = vcmp.eq.s32.totalorder %v1228_v11, %v1222_v8  ;;  %vm815_vm14 = vcmp.eq.s32.totalorder %v1243_v20, %v1222_v8 }
 0x343   :  { %671 = vmatprep.subr.bf16.mxu1 %v1169_v16  ;;  %vm1670_vm11 = vmpackc.low %vm814_vm6, %vm813_vm2 }
 0x344   :  { %vm1682_vm7 = vmpackc.low %vm813_vm2, %vm815_vm14  ;;  %vm872_vm2 = vcmp.eq.s32.totalorder %v1222_v8, %v1228_v11 }
 0x345   :  { %545 = vmatmul.mubr.bf16.gmra.mrb[16].mxu1 %v496_v35 }
 0x346   :  { %1005 = vmatpush1.bf16.msk.msra.mxu1 %vm1003_vm9, %v1004_v36  ;;  %vm1693_vm9 = vmpackc.low %vm815_vm14, %vm814_vm6 }
 0x347   :  { %673 = vmatprep.subr.bf16.mxu1 %v1169_v16 }
 0x34a   :  { %1008 = vmatpush1.bf16.msk.msra.mxu1 %vm1006_vm0, %v998_v34 }
 0x34b   :  { %675 = vmatprep.subr.bf16.mxu1 %v1169_v16 }
 0x34e   :  { %1011 = vmatpush1.bf16.msk.msra.mxu1 %vm1009_vm10, %v1001_v32 }
 0x34f   :  { %677 = vmatprep.subr.bf16.mxu1 %v1169_v16 }
 0x352   :  { %1014 = vmatpush1.bf16.msk.msra.mxu1 %vm1012_vm1, %v1004_v36 }
 0x353   :  { %679 = vmatprep.subr.bf16.mxu1 %v1169_v16 }
 0x356   :  { %1017 = vmatpush1.bf16.msk.msra.mxu1 %vm1015_vm3, %v998_v34 }
 0x357   :  { %681 = vmatprep.subr.bf16.mxu1 %v1169_v16 }
 0x35a   :  { %1020 = vmatpush1.bf16.msk.msra.mxu1 %vm1018_vm5, %v1001_v32 }
 0x35b   :  { %683 = vmatprep.subr.bf16.mxu1 %v1169_v16 }
 0x35e   :  { %1023 = vmatpush1.bf16.msk.msra.mxu1 %vm1021_vm8, %v1004_v36  ;;  %vm1827_vm8 = vcmask 261120  }
 0x35f   :  { %685 = vmatprep.subr.bf16.mxu1 %v1169_v16 }
 0x362   :  { %1026 = vmatpush1.bf16.msk.msra.mxu1 %vm1024_vm4, %v998_v34  ;;  %vm1828_vm4 = vmmov %vm1827_vm8 }
 0x363   :  { %687 = vmatprep.subr.bf16.mxu1 %v1169_v16 }
 0x366   :  { %1029 = vmatpush1.bf16.msk.msra.mxu1 %vm1027_vm12, %v1001_v32  ;;  %vm1173_vm12 = vmmov 0  }
 0x367   :  { %689 = vmatprep.subr.bf16.mxu1 %v1169_v16 }
 0x36a   :  { %1032 = vmatpush1.bf16.msk.msra.mxu1 %vm1030_vm15, %v1004_v36  ;;  %vm871_vm15 = vcmp.eq.s32.totalorder %v1222_v8, %v1224_v9 }
 0x36b   :  { %1089 = vmatprep.subr.bf16.mxu1 %v1124_v53  ;;  %vm873_vm6 = vmor %vm871_vm15, %vm872_vm2 }
 0x410   :  { %v538_v18 = vpop.f32.mrb[12].mxu1 }
 0x411   :  { %v540_v33 = vpop.f32.mrb[13].mxu1  ;;  %1138 = vrcp.f32 %v538_v18 }
 0x412   :  { %v541_v37 = vpop.f32.mrb[14].mxu1 }
 0x413   :  { %1140 = vrcp.f32 %v541_v37  ;;  %v543_v40 = vpop.f32.mrb[15].mxu1 }
 0x418   :  { %v546_v41 = vpop.f32.mrb[16].mxu1 }
 0x419   :  { %1142 = vrcp.f32 %v546_v41  ;;  %v548_v43 = vpop.f32.mrb[17].mxu1 }
 0x41a   :  { %v549_v44 = vpop.f32.mrb[18].mxu1 }
 0x41b   :  { %v550_v46 = vpop.f32.mrb[19].mxu1  ;;  %v1139_v39 = vpop.eup %1138 }
 0x41d   :  { %v1141_v42 = vpop.eup %1140 }
 0x41e   :  { %v555_v38 = vpack.c.bf16 %v1141_v42, %v1139_v39 }
 0x420   :  { %995 = vmatmul.mubr.msk.bf16.vlgmr.msra.gmra.mrb[8].mxu0 %vm557_vm13, %v555_v38 }
 0x421   :  { %642 = vmatprep.mubr.bf16.mxu0 %v1169_v16  ;;  %1044 = vmatpush1.bf16.msk.msra.mxu0 %vm1670_vm11, %v1171_v27 }
 0x422   :  { %832 = vmatprep.subr.bf16.mxu0 %v1169_v16 }
 0x423   :  { %v1143_v50 = vpop.eup %1142 }
 0x424   :  { %v556_v51 = vpack.c.bf16 %v1143_v50, %v1143_v50  ;;  %v1035_v50 = vld [vmem:[%s1788_s4] ss:$0 sm:$0xff]  ;;  %s1174_s4 = smov [#allocation2]  }
 0x425   :  { %1046 = vmatpush1.bf16.msk.msra.mxu0 %vm1682_vm7, %v1171_v27  ;;  %s941_s9 = sshll.u32 %s1174_s4, 4  ;;  %s942_s9 = int_to_ptr.vmem [resolvable:$true] %s941_s9 }
 0x426   :  { %834 = vmatprep.subr.bf16.mxu0 %v1169_v16  ;;  %s1144_s10 = scalar_lea.vmem %s942_s9, 128  ;;  %p1149_p1 = scmp.lt.s32.totalorder %s942_s9, %s942_s9 }
 0x427   :  { %p1145_p0 = scmp.ne.s32.totalorder %s942_s9, %s1144_s10  ;;  %p1150_p2 = scmp.lt.s32.totalorder %s1144_s10, %s1144_s10 }
 0x428   :  { %996 = vmatmul.mubr.msk.bf16.gmra.mrb[12].mxu0 %vm557_vm13, %v556_v51  ;;  %vm1821_vm13 = vcmask 523264  }
 0x429   :  { %1048 = vmatpush1.bf16.msk.msra.mxu0 %vm1693_vm9, %v1171_v27  ;;  %vm1822_vm0 = vmmov %vm1821_vm13  ;;  %p1151_p3 = por %p1150_p2, %p1149_p1 }
 0x42a   :  { %836 = vmatprep.subr.bf16.mxu0 %v1169_v16  ;;  %vm1823_vm10 = vmmov %vm1822_vm0 }
 0x42b   :  { %vm1824_vm1 = vmmov %vm1822_vm0  ;;  %p1152_p4 = pnand %p1151_p3, %p1145_p0 }
 0x42c   :  { %vm1825_vm3 = vmmov %vm1822_vm0 }
 0x42d   :  { %1050 = vmatpush1.bf16.msk.msra.mxu0 %vm1670_vm11, %v1171_v27  ;;  %vm1826_vm5 = vmmov %vm1822_vm0 }
 0x42e   :  { %838 = vmatprep.subr.bf16.mxu0 %v1169_v16 }
 0x431   :  { %1052 = vmatpush1.bf16.msk.msra.mxu0 %vm1682_vm7, %v1171_v27 }
 0x432   :  { %840 = vmatprep.subr.bf16.mxu0 %v1169_v16 }
 0x435   :  { %1054 = vmatpush1.bf16.msk.msra.mxu0 %vm1693_vm9, %v1171_v27 }
 0x436   :  { %842 = vmatprep.subr.bf16.mxu0 %v1169_v16 }
 0x439   :  { %1056 = vmatpush1.bf16.msk.msra.mxu0 %vm1670_vm11, %v1171_v27 }
 0x43a   :  { %844 = vmatprep.subr.bf16.mxu0 %v1169_v16 }
 0x43d   :  { %1058 = vmatpush1.bf16.msk.msra.mxu0 %vm1682_vm7, %v1171_v27 }
 0x43e   :  { %846 = vmatprep.subr.bf16.mxu0 %v1169_v16 }
 0x441   :  { %1060 = vmatpush1.bf16.msk.msra.mxu0 %vm1693_vm9, %v1171_v27 }
 0x442   :  { %848 = vmatprep.subr.bf16.mxu0 %v1169_v16 }
 0x445   :  { %1062 = vmatpush1.bf16.msk.msra.mxu0 %vm1670_vm11, %v1171_v27  ;;  %vm874_vm11 = vcmp.eq.s32.totalorder %v1222_v8, %v1243_v20 }
 0x446   :  { %850 = vmatprep.subr.bf16.mxu0 %v1169_v16  ;;  %vm875_vm14 = vmor %vm873_vm6, %vm874_vm11 }
 0x449   :  { %1064 = vmatpush1.bf16.msk.msra.mxu0 %vm1682_vm7, %v1171_v27  ;;  %vm890_vm7 = vcmask 1043456  }
 0x44a   :  { %852 = vmatprep.subr.bf16.mxu0 %v1169_v16 }
 0x44d   :  { %1066 = vmatpush1.bf16.msk.msra.mxu0 %vm1693_vm9, %v1171_v27  ;;  %vm886_vm9 = vcmask 195584  }
 0x4f3   :  { %v634_v28 = vpop.f32.mrb[8].mxu0 }
 0x4f4   :  { %v636_v30 = vpop.f32.mrb[9].mxu0  ;;  %v651_v56 = vmul.f32 %v1581_v13, %v634_v28 }
 0x4f5   :  { %v652_v54 = vmul.f32 %v1583_v15, %v636_v30  ;;  %v638_v55 = vpop.f32.mrb[10].mxu0 }
 0x4f6   :  { %v653_v58 = vmul.f32 %v1586_v17, %v638_v55  ;;  %v640_v59 = vpop.f32.mrb[11].mxu0 }
 0x4f7   :  { %v654_v16 = vmul.f32 %v1588_v22, %v640_v59  ;;  %v802_v27 = vsel %vm1821_vm13, %v652_v54, 0.0  ;;  %vm1829_vm13 = vmmov %vm1828_vm4 }
 0x4f8   :  { %v657_v61 = vpack.c.bf16 %v653_v58, %v651_v56  ;;  %v794_v0 = vadd.f32 %v653_v58, %v651_v56  ;;  %v1068_v58 = vsel %vm875_vm14, 1.0, %v1168_v14 }
 0x4f9   :  { %v658_v3 = vpack.c.bf16 %v654_v16, %v652_v54  ;;  %v803_v60 = vsel %vm1822_vm0, %v654_v16, 0.0 }
 0x4fa   :  { %v804_v62 = vadd.f32 %v803_v60, %v802_v27 }
 0x4fb   :  { %v644_v4 = vpop.f32.mrb[12].mxu0  ;;  %1033 = vmatprep.mubr.msk.bf16.mxu1 %vm1823_vm10, %v658_v3 }
 0x4fc   :  { %v655_v1 = vmul.f32 %v1607_v29, %v644_v4  ;;  %v646_v2 = vpop.f32.mrb[13].mxu0  ;;  %700 = vmatmul.mubr.bf16.vlgmr.msra.gmra.mrb[20].mxu1 %v657_v61 }
 0x4fd   :  { %v656_v5 = vmul.f32 %v1598_v24, %v646_v2  ;;  %v648_v6 = vpop.f32.mrb[14].mxu0  ;;  %1090 = vmatpush3.bf16.msra.mxu1 %v1124_v53 }
 0x4fe   :  { %v795_v10 = vadd.f32 %v794_v0, %v655_v1  ;;  %v649_v12 = vpop.f32.mrb[15].mxu0  ;;  %v659_v21 = vpack.c.bf16 %v655_v1, %v655_v1  ;;  %1091 = vmatprep.subr.bf16.mxu1 %v1125_v63 }
 0x4ff   :  { %v660_v13 = vpack.c.bf16 %v656_v5, %v656_v5  ;;  %v805_v15 = vsel %vm1824_vm1, %v656_v5, 0.0 }
 0x500   :  { %v796_v17 = vrot.slane %v795_v10, 4  ;;  %v806_v19 = vadd.f32 %v805_v15, %v804_v62 }
 0x501   :  { %1034 = vmatprep.mubr.msk.bf16.mxu1 %vm1825_vm3, %v660_v13  ;;  %1092 = vmatpush3.bf16.msra.mxu1 %v1125_v63 }
 0x502   :  { %v797_v22 = vadd.f32 %v796_v17, %v795_v10  ;;  %v807_v23 = vrot.slane %v806_v19, 4  ;;  %1097 = vmatprep.subr.bf16.mxu1 %v1168_v14 }
 0x504   :  { %v798_v31 = vrot.slane %v797_v22, 2  ;;  %v808_v34 = vadd.f32 %v807_v23, %v806_v19  ;;  %708 = vmatmul.mubr.bf16.gmra.mrb[24].mxu1 %v659_v21 }
 0x506   :  { %v799_v25 = vadd.f32 %v798_v31, %v797_v22  ;;  %v809_v26 = vrot.slane %v808_v34, 2 }
 0x508   :  { %v800_v24 = vrot.slane %v799_v25, 1  ;;  %v810_v29 = vadd.f32 %v809_v26, %v808_v34 }
 0x50a   :  { %v811_v32 = vrot.slane %v810_v29, 1  ;;  %v801_v35 = vadd.f32 %v800_v24, %v799_v25 }
 0x50c   :  { %v812_v36 = vadd.f32 %v811_v32, %v810_v29  ;;  %v825_v57 = vpack.c.bf16 %v801_v35, %v801_v35 }
 0x50e   :  { %v826_v45 = vpack.c.bf16 %v812_v36, %v812_v36 }
 0x510   :  { %1067 = vmatprep.mubr.msk.bf16.mxu0 %vm1826_vm5, %v826_v45 }
 0x511   :  { %863 = vmatmul.mubr.bf16.vlgmr.msra.gmra.mrb[16].mxu0 %v825_v57 }
 0x5cf   :  { %v701_v47 = vpop.f32.mrb[20].mxu1 }
 0x5d0   :  { %v703_v7 = vpop.f32.mrb[21].mxu1 }
 0x5d1   :  { %v704_v18 = vpop.f32.mrb[22].mxu1 }
 0x5d2   :  { %v715_v33 = vpack.c.bf16 %v704_v18, %v701_v47  ;;  %v706_v37 = vpop.f32.mrb[23].mxu1 }
 0x5d4   :  { %1093 = vmatprep.mubr.msk.bf16.mxu1 %vm1827_vm8, %v715_v33 }
 0x5d7   :  { %v709_v40 = vpop.f32.mrb[24].mxu1 }
 0x5d8   :  { %v716_v41 = vpack.c.bf16 %v709_v40, %v709_v40  ;;  %v711_v43 = vpop.f32.mrb[25].mxu1 }
 0x5d9   :  { %v712_v44 = vpop.f32.mrb[26].mxu1 }
 0x5da   :  { %v713_v46 = vpop.f32.mrb[27].mxu1  ;;  %1094 = vmatmul.mubr.msk.bf16.vlgmr.msra.gmra.mrb[28].mxu1 %vm1828_vm4, %v716_v41 }
 0x5db   :  { %1101 = vmatprep.mubr.msk.bf16.mxu1 %vm1173_vm12, %v1168_v14 }
 0x5e4   :  { %v864_v39 = vpop.f32.mrb[16].mxu0 }
 0x5e5   :  { %v866_v42 = vpop.f32.mrb[17].mxu0  ;;  %v870_v51 = vmul.f32 0.015625, %v864_v39 }
 0x5e6   :  { %v867_v38 = vpop.f32.mrb[18].mxu0 }
 0x5e7   :  { %v868_v48 = vpop.f32.mrb[19].mxu0  ;;  %v881_v11 = vrot.slane %v870_v51, %v880_v52 }
 0x5e9   :  { %v882_v20 = vmul.f32 %v1068_v58, %v881_v11 }
 0x5eb   :  { %v883_v9 = vpack.c.bf16 %v882_v20, %v882_v20 }
 0x6ad   :  { %v1095_v49 = vpop.f32.mrb[28].mxu1 }
 0x6ae   :  { %v780_v53 = vpop.f32.mrb[29].mxu1  ;;  %v789_v30 = vadd.f32 %v1095_v49, %v1035_v50 }
 0x6af   :  { %v1096_v28 = vpop.f32.mrb[30].mxu1  ;;  %v781_v55 = vadd.f32 %v1035_v50, %v780_v53 }
 0x6b0   :  { %v783_v54 = vpop.f32.mrb[31].mxu1  ;;  %v885_v8 = vpack.c.bf16 %v789_v30, %v789_v30 }
 0x6b1   :  { %v784_v56 = vadd.f32 %v1035_v50, %v783_v54 }
 0x6b2   :  { %v892_v16 = vsel %vm890_vm7, %v885_v8, 0 }
 0x6b3   :  { %v884_v59 = vpack.c.bf16 %v784_v56, %v781_v55 }
 0x6b5   :  { %1098 = vmatpush3.bf16.msra.mxu1 %v884_v59 }
 0x6b6   :  { %1099 = vmatprep.subr.bf16.mxu1 %v1168_v14 }
 0x6b9   :  { %1100 = vmatpush3.bf16.msra.mxu1 %v892_v16 }
 0x6bc   :  { %1102 = vmatmul.mubr.msk.bf16.vlgmr.msra.gmra.mrb[32].mxu1 %vm886_vm9, %v883_v9 }
 0x78f   :  { %v928_v61 = vpop.f32.mrb[32].mxu1 }
 0x790   :  { %934 = vst.msk [vmem:[#allocation2] sm:$0xff] %vm1829_vm13, %v928_v61  ;;  %v1103_v0 = vpop.f32.mrb[33].mxu1 }
 0x791   :  { %v931_v27 = vpop.f32.mrb[34].mxu1 }
 0x792   :  { %1155 = shalt.err (!%p1152_p4)
}
 0x793   :  { %s1156_s13 = scalar_lea.hbm %s1789_s5, 128 }
 0x794   :  { %p1157_p5 = scmp.ne.s32.totalorder %s1789_s5, %s1156_s13  ;;  %p1160_p6 = scmp.lt.u32.totalorder %s1156_s13, %s1789_s5 }
 0x796   :  { %p1162_p7 = pnand %p1160_p6, %p1157_p5 }
 0x798   :  { %1165 = shalt.err (!%p1162_p7)
}
 0x799   :  { %944 = dma.vmem_to_hbm [thread:$0]  %s942_s9, 128, %s1789_s5, [#allocation3]   ;;  %v1104_v14 = vpop.f32.mrb[35].mxu1 }
 0x79a   :  { %1166 = dma.done.wait [#allocation3], 128  }
 0x79b   :  { %1167 = vsyncadd [#allocation3], 4294967168 }
 0x79c   :  { %948 = vsyncpa [#allocation3], 1 }

</bundles_post_ra>
